<compile_context>
chip_gen: v6e
topology: v6e:2x2x1
jax: 0.10.0
libtpu: 0.0.40
codegen_flags: <defaults>
</compile_context>

<pallas_src>
from functools import partial

import numpy as np
import jax
import jax.numpy as jnp
from jax import lax
from jax.experimental import pallas as pl
from jax.experimental.pallas import tpu as pltpu


# ----------------------------------------------------------------------------
# Kernel
# ----------------------------------------------------------------------------
def _make_kernel(H, NB, nl, has_projection):
    """Fused BasicBlock kernel (stride=1, BN folded, bf16 operands).

    H  : image height (rows per image)            -- trace-time constant
    NB : images folded into one grid step (M=NB*H) -- trace-time constant
    nl : output row width Wo*Cout (lanes)
    """
    M = NB * H

    def _row_masks():
        # Row-in-image boundary masks from an iota; the block always starts at
        # an image boundary and holds NB whole images, so first/last rows sit
        # at statically known offsets (no integer div/mod needed).
        row = lax.broadcasted_iota(jnp.int32, (M, 1), 0)
        is_first = row == 0
        is_last = row == (H - 1)
        for b in range(1, NB):
            is_first = jnp.logical_or(is_first, row == b * H)
            is_last = jnp.logical_or(is_last, row == b * H + (H - 1))
        return jnp.logical_not(is_first), jnp.logical_not(is_last)

    def _combine_taps(r, not_first, not_last):
        """r: (M, 3*nl) f32 = [X@T0 | X@T1 | X@T2] (vertical taps dy=0,1,2).

        out[y] = (X@T1)[y] + (X@T0)[y-1] + (X@T2)[y+1], with the up/down
        contributions shifted via XLU sublane rolls and masked at image
        boundaries (vertical zero padding).
        """
        p0 = r[:, 0 * nl:1 * nl]
        p1 = r[:, 1 * nl:2 * nl]
        p2 = r[:, 2 * nl:3 * nl]
        up = pltpu.roll(p0, shift=1, axis=0)        # row y <- (X@T0)[y-1]
        dn = pltpu.roll(p2, shift=M - 1, axis=0)    # row y <- (X@T2)[y+1]
        return (p1
                + jnp.where(not_first, up, 0.0)
                + jnp.where(not_last, dn, 0.0))

    def kernel(x_ref, w1_ref, w2_ref, b1_ref, b2_ref, o_ref):
        xv = x_ref[...]                              # (M, W*Cin) bf16
        not_first, not_last = _row_masks()

        # ---- conv1 + BN1 (+ folded 1x1 projection): ONE wide MXU matmul ----
        r1 = jnp.dot(xv, w1_ref[...], preferred_element_type=jnp.float32)
        out1 = jnp.maximum(
            _combine_taps(r1[:, :3 * nl], not_first, not_last) + b1_ref[...],
            0.0)

        # ---- conv2 + BN2: ONE wide MXU matmul ----
        r2 = jnp.dot(out1.astype(jnp.bfloat16), w2_ref[...],
                     preferred_element_type=jnp.float32)
        out2 = _combine_taps(r2, not_first, not_last) + b2_ref[...]

        # ---- shortcut ----
        if has_projection:
            sc = r1[:, 3 * nl:4 * nl]                # 1x1 proj + BN, rode along
        else:
            sc = xv.astype(jnp.float32)              # identity (Cin==Cout)

        # ---- residual add + final ReLU, lane-dense bf16 store ----
        o_ref[...] = jnp.maximum(out2 + sc, 0.0).astype(o_ref.dtype)

    return kernel


# ----------------------------------------------------------------------------
# Wrapper-side weight preprocessing (runs once in XLA, outside the kernel)
# ----------------------------------------------------------------------------
def _row_toeplitz(w_hwio, scale, w_in, stride=1, pad=1):
    """(3,3,Ci,Co) conv weight (BN scale folded) -> (3, w_in*Ci, wo*Co)."""
    kh, kw, ci, co = w_hwio.shape
    wo = (w_in + 2 * pad - kw) // stride + 1
    wf = w_hwio * scale.reshape(1, 1, 1, co)
    t = jnp.zeros((kh, w_in * ci, wo * co), jnp.float32)
    for xo in range(wo):
        for dx in range(kw):
            xi = xo * stride + dx - pad
            if 0 <= xi < w_in:                 # out-of-range taps = zero padding
                t = t.at[:, xi * ci:(xi + 1) * ci,
                         xo * co:(xo + 1) * co].set(wf[:, dx])
    return t


def _row_blockdiag(wsc, scale, w_in, stride=1):
    """1x1 conv (Ci,Co) with BN scale folded -> (w_in*Ci, wo*Co) block matrix."""
    ci, co = wsc.shape
    wo = (w_in - 1) // stride + 1
    wf = wsc * scale.reshape(1, co)
    m = jnp.zeros((w_in * ci, wo * co), jnp.float32)
    for xo in range(wo):
        xi = xo * stride
        m = m.at[xi * ci:(xi + 1) * ci, xo * co:(xo + 1) * co].set(wf)
    return m


def _pick_batch_block(n, h, target_rows=512, min_steps=2):
    """Pick nb (images per grid step).

    Largest divisor of n with nb*h <= target_rows whose block keeps the
    sublane dim a multiple of 8 (unless it is the full array), preferring
    configurations with >= min_steps grid steps so v7x's two TensorCores both
    get work.
    """
    divisors = [d for d in range(1, n + 1) if n % d == 0]
    valid = [d for d in divisors
             if d * h <= target_rows and (d == n or (d * h) % 8 == 0)]
    if not valid:
        valid = [1]
    multi = [d for d in valid if n // d >= min_steps]
    return max(multi) if multi else max(valid)


# ----------------------------------------------------------------------------
# Public forward (channels-last NHWC in / NHWC out)
# ----------------------------------------------------------------------------
@partial(jax.jit, static_argnames=("stride",))
def basic_block_forward(x_nhwc, params, stride=1):
    """Pallas implementation of BasicBlock.forward. x_nhwc: (N, H, W, Cin)."""
    if stride != 1:
        # TODO(synk): stride != 1 not implemented in the Pallas path.
        raise NotImplementedError("Pallas BasicBlock supports stride=1 only")

    n, h, w, cin = x_nhwc.shape
    cout = params["w1"].shape[-1]
    ho, wo = h, w
    has_proj = "wsc" in params
    k1 = w * cin                               # input row width (lanes)
    nl = wo * cout                             # output row width (lanes)

    # Row-matrix view (N*H, W*Cin): contiguous reshape of NHWC, no transpose.
    x_rows = x_nhwc.reshape(n * h, k1).astype(jnp.bfloat16)

    # Fold BN scale into the weights; fuse the 3 vertical taps (and the 1x1
    # projection, when present) along N into a single matrix per conv.
    t1 = _row_toeplitz(params["w1"], params["s1"], w, stride)
    w1f = jnp.concatenate([t1[0], t1[1], t1[2]], axis=1)       # (k1, 3*nl)
    if has_proj:
        psc = _row_blockdiag(params["wsc"], params["ssc"], w, stride)
        w1f = jnp.concatenate([w1f, psc], axis=1)               # (k1, 4*nl)
    w1f = w1f.astype(jnp.bfloat16)

    t2 = _row_toeplitz(params["w2"], params["s2"], wo, 1)
    w2f = jnp.concatenate([t2[0], t2[1], t2[2]], axis=1).astype(jnp.bfloat16)

    b1 = jnp.tile(params["b1"].reshape(-1), wo).reshape(1, nl).astype(jnp.float32)
    b2v = params["b2"] + (params["bsc"] if has_proj else 0.0)   # proj bias folded
    b2 = jnp.tile(b2v.reshape(-1), wo).reshape(1, nl).astype(jnp.float32)

    nb = _pick_batch_block(n, h)               # images folded into M per step
    mb = nb * h
    n1 = w1f.shape[-1]

    # Explicit VMEM budget: double-buffered activations + resident weights +
    # generous f32 intermediates, floored at 16 MiB, capped at 48 MiB (v7x).
    vmem_bytes = (2 * mb * (k1 + nl) * 2
                  + 2 * (k1 * n1 + nl * 3 * nl) * 2
                  + 4 * mb * (n1 + 4 * nl) * 4)
    vmem_limit = int(min(max(2 * vmem_bytes, 16 << 20), 48 << 20))

    out_rows = pl.pallas_call(
        _make_kernel(h, nb, nl, has_proj),
        out_shape=jax.ShapeDtypeStruct((n * ho, nl), jnp.bfloat16),
        grid_spec=pltpu.PrefetchScalarGridSpec(
            num_scalar_prefetch=0,
            grid=(n // nb,),
            in_specs=[
                pl.BlockSpec((mb, k1), lambda i: (i, 0)),        # activation rows
                pl.BlockSpec((k1, n1), lambda i: (0, 0)),        # conv1(+proj) fused
                pl.BlockSpec((nl, 3 * nl), lambda i: (0, 0)),    # conv2 fused
                pl.BlockSpec((1, nl), lambda i: (0, 0)),         # bias1
                pl.BlockSpec((1, nl), lambda i: (0, 0)),         # bias2 (+proj bias)
            ],
            out_specs=pl.BlockSpec((mb, nl), lambda i: (i, 0)),
        ),
        compiler_params=pltpu.CompilerParams(
            dimension_semantics=("parallel",),
            vmem_limit_bytes=vmem_limit),
    )(x_rows, w1f, w2f, b1, b2)

    # Contiguous (free) reshape back to NHWC; stays bf16 for downstream blocks.
    return out_rows.reshape(n, ho, wo, cout)


# ----------------------------------------------------------------------------
# Plain-JAX reference (NHWC, mirrors eval-mode BN folding + bf16 rounding)
# ----------------------------------------------------------------------------
def basic_block_reference(x_nhwc, params, stride=1):
    q = lambda a: a.astype(jnp.bfloat16).astype(jnp.float32)
    dn = ("NHWC", "HWIO", "NHWC")
    hp = lax.Precision.HIGHEST
    cout = params["w1"].shape[-1]

    x = q(x_nhwc.astype(jnp.float32))
    w1 = q(params["w1"] * params["s1"].reshape(1, 1, 1, -1))
    w2 = q(params["w2"] * params["s2"].reshape(1, 1, 1, -1))

    y = lax.conv_general_dilated(x, w1, (stride, stride), ((1, 1), (1, 1)),
                                 dimension_numbers=dn, precision=hp)
    y = jnp.maximum(y + params["b1"].reshape(1, 1, 1, -1), 0.0)
    y = q(y)
    y = lax.conv_general_dilated(y, w2, (1, 1), ((1, 1), (1, 1)),
                                 dimension_numbers=dn, precision=hp)
    y = y + params["b2"].reshape(1, 1, 1, -1)

    if "wsc" in params:
        cin = x.shape[-1]
        wsc = q((params["wsc"] * params["ssc"].reshape(1, -1))
                .reshape(1, 1, cin, cout))
        sc = lax.conv_general_dilated(x, wsc, (stride, stride), ((0, 0), (0, 0)),
                                      dimension_numbers=dn, precision=hp)
        sc = sc + params["bsc"].reshape(1, 1, 1, -1)
    else:
        sc = x
    return jnp.maximum(y + sc, 0.0)


# ----------------------------------------------------------------------------
# Deterministic synthetic parameters (BN folded to scale/bias; eval mode)
# ----------------------------------------------------------------------------
def init_basic_block_params(key, in_channels, out_channels, stride=1, eps=1e-5):
    ks = jax.random.split(key, 6)

    def bn_fold(k, c):
        kg, kb, km, kv = jax.random.split(k, 4)
        gamma = 1.0 + 0.1 * jax.random.normal(kg, (c,), jnp.float32)
        beta = 0.1 * jax.random.normal(kb, (c,), jnp.float32)
        mean = 0.1 * jax.random.normal(km, (c,), jnp.float32)
        var = 1.0 + 0.1 * jnp.abs(jax.random.normal(kv, (c,), jnp.float32))
        scale = gamma / jnp.sqrt(var + eps)
        return scale, beta - mean * scale

    w1 = 0.2 * jax.random.normal(ks[0], (3, 3, in_channels, out_channels), jnp.float32)
    w2 = 0.2 * jax.random.normal(ks[1], (3, 3, out_channels, out_channels), jnp.float32)
    s1, b1 = bn_fold(ks[2], out_channels)
    s2, b2 = bn_fold(ks[3], out_channels)
    p = dict(w1=w1, w2=w2, s1=s1, b1=b1, s2=s2, b2=b2)
    if stride != 1 or in_channels != out_channels:
        p["wsc"] = 0.2 * jax.random.normal(ks[4], (in_channels, out_channels),
                                           jnp.float32)
        p["ssc"], p["bsc"] = bn_fold(ks[5], out_channels)
    return p


if __name__ == "__main__":
    key = jax.random.PRNGKey(0)
    kx, kp, kx2, kp2 = jax.random.split(key, 4)

    # Config A: projection shortcut (Cin != Cout), stride 1.  NHWC layout.
    n, cin, h, w, cout = 2, 4, 16, 16, 8
    x = jax.random.normal(kx, (n, h, w, cin), jnp.float32)
    params = init_basic_block_params(kp, cin, cout, stride=1)
    out = jax.block_until_ready(basic_block_forward(x, params, stride=1))
    assert out.shape == (n, h, w, cout)
    ref = basic_block_reference(x, params, stride=1)
    np.testing.assert_allclose(np.asarray(out.astype(jnp.float32)),
                               np.asarray(ref), rtol=2e-2, atol=2e-2)

    # Config B: identity shortcut (Cin == Cout), stride 1.
    x2 = jax.random.normal(kx2, (n, h, w, cout), jnp.float32)
    params2 = init_basic_block_params(kp2, cout, cout, stride=1)
    out2 = jax.block_until_ready(basic_block_forward(x2, params2, stride=1))
    ref2 = basic_block_reference(x2, params2, stride=1)
    np.testing.assert_allclose(np.asarray(out2.astype(jnp.float32)),
                               np.asarray(ref2), rtol=2e-2, atol=2e-2)

    print("KERNEL_OK")
</pallas_src>

<mosaic_0001>
module attributes {stable_mosaic.version = 11 : i64} {
  func.func @kernel(%arg0: i32, %arg1: memref<16x64xbf16, #tpu.memory_space<vmem>>, %arg2: memref<64x512xbf16, #tpu.memory_space<vmem>>, %arg3: memref<128x384xbf16, #tpu.memory_space<vmem>>, %arg4: memref<1x128xf32, #tpu.memory_space<vmem>>, %arg5: memref<1x128xf32, #tpu.memory_space<vmem>>, %arg6: memref<16x128xbf16, #tpu.memory_space<vmem>>) attributes {dimension_semantics = [#tpu.dimension_semantics<parallel>], iteration_bounds = array<i64: 2>, scalar_prefetch = 0 : i64, scratch_operands = 0 : i64, tpu.core_type = #tpu.core_type<tc>, window_params = [{transform_indices = @transform_0, window_bounds = array<i64: 16, 64>}, {pipeline_mode = #tpu.pipeline_mode<synchronous>, transform_indices = @transform_1, window_bounds = array<i64: 64, 512>}, {pipeline_mode = #tpu.pipeline_mode<synchronous>, transform_indices = @transform_2, window_bounds = array<i64: 128, 384>}, {pipeline_mode = #tpu.pipeline_mode<synchronous>, transform_indices = @transform_3, window_bounds = array<i64: 1, 128>}, {pipeline_mode = #tpu.pipeline_mode<synchronous>, transform_indices = @transform_4, window_bounds = array<i64: 1, 128>}, {transform_indices = @transform_5, window_bounds = array<i64: 16, 128>}]} {
    %c0 = arith.constant 0 : index
    %c0_0 = arith.constant 0 : index
    %0 = vector.load %arg1[%c0, %c0_0] : memref<16x64xbf16, #tpu.memory_space<vmem>>, vector<16x64xbf16>
    %1 = tpu.iota {dimensions = array<i32: 0>} : vector<16x1xi32>
    %c0_i32 = arith.constant 0 : i32
    %2 = vector.broadcast %c0_i32 : i32 to vector<16x1xi32>
    %3 = arith.cmpi eq, %1, %2 : vector<16x1xi32>
    %c15_i32 = arith.constant 15 : i32
    %4 = vector.broadcast %c15_i32 : i32 to vector<16x1xi32>
    %5 = arith.cmpi eq, %1, %4 : vector<16x1xi32>
    %cst = arith.constant dense<true> : vector<16x1xi1>
    %6 = arith.xori %3, %cst : vector<16x1xi1>
    %cst_1 = arith.constant dense<true> : vector<16x1xi1>
    %7 = arith.xori %5, %cst_1 : vector<16x1xi1>
    %c0_2 = arith.constant 0 : index
    %c0_3 = arith.constant 0 : index
    %8 = vector.load %arg2[%c0_2, %c0_3] : memref<64x512xbf16, #tpu.memory_space<vmem>>, vector<64x512xbf16>
    %cst_4 = arith.constant dense<0.000000e+00> : vector<16x512xf32>
    %9 = tpu.matmul %0, %8, %cst_4 {dimension_numbers = #tpu.dot_dimension_numbers<[1], [0], [0], [1], [0, 0, 1, 1], [], []>} : vector<16x64xbf16>, vector<64x512xbf16>, vector<16x512xf32> -> vector<16x512xf32>
    %10 = vector.extract_strided_slice %9 {offsets = [0, 0], sizes = [16, 384], strides = [1, 1]} : vector<16x512xf32> to vector<16x384xf32>
    %11 = vector.extract_strided_slice %10 {offsets = [0, 0], sizes = [16, 128], strides = [1, 1]} : vector<16x384xf32> to vector<16x128xf32>
    %12 = vector.extract_strided_slice %10 {offsets = [0, 128], sizes = [16, 128], strides = [1, 1]} : vector<16x384xf32> to vector<16x128xf32>
    %13 = vector.extract_strided_slice %10 {offsets = [0, 256], sizes = [16, 128], strides = [1, 1]} : vector<16x384xf32> to vector<16x128xf32>
    %c1_i32 = arith.constant 1 : i32
    %14 = tpu.dynamic_rotate %11 by %c1_i32 dim 0 : vector<16x128xf32>, i32 -> vector<16x128xf32>
    %c15_i32_5 = arith.constant 15 : i32
    %15 = tpu.dynamic_rotate %13 by %c15_i32_5 dim 0 : vector<16x128xf32>, i32 -> vector<16x128xf32>
    %cst_6 = arith.constant 0.000000e+00 : f32
    %16 = vector.shape_cast %6 : vector<16x1xi1> to vector<16x1xi1>
    %17 = vector.broadcast %16 : vector<16x1xi1> to vector<16x128xi1>
    %18 = vector.broadcast %cst_6 : f32 to vector<16x128xf32>
    %19 = arith.select %17, %14, %18 : vector<16x128xi1>, vector<16x128xf32>
    %20 = arith.addf %12, %19 : vector<16x128xf32>
    %cst_7 = arith.constant 0.000000e+00 : f32
    %21 = vector.shape_cast %7 : vector<16x1xi1> to vector<16x1xi1>
    %22 = vector.broadcast %21 : vector<16x1xi1> to vector<16x128xi1>
    %23 = vector.broadcast %cst_7 : f32 to vector<16x128xf32>
    %24 = arith.select %22, %15, %23 : vector<16x128xi1>, vector<16x128xf32>
    %25 = arith.addf %20, %24 : vector<16x128xf32>
    %c0_8 = arith.constant 0 : index
    %c0_9 = arith.constant 0 : index
    %26 = vector.load %arg4[%c0_8, %c0_9] : memref<1x128xf32, #tpu.memory_space<vmem>>, vector<1x128xf32>
    %27 = vector.broadcast %26 : vector<1x128xf32> to vector<16x128xf32>
    %28 = arith.addf %25, %27 : vector<16x128xf32>
    %cst_10 = arith.constant 0.000000e+00 : f32
    %29 = vector.broadcast %cst_10 : f32 to vector<16x128xf32>
    %30 = arith.maximumf %28, %29 : vector<16x128xf32>
    %31 = arith.truncf %30 : vector<16x128xf32> to vector<16x128xbf16>
    %c0_11 = arith.constant 0 : index
    %c0_12 = arith.constant 0 : index
    %32 = vector.load %arg3[%c0_11, %c0_12] : memref<128x384xbf16, #tpu.memory_space<vmem>>, vector<128x384xbf16>
    %cst_13 = arith.constant dense<0.000000e+00> : vector<16x384xf32>
    %33 = tpu.matmul %31, %32, %cst_13 {dimension_numbers = #tpu.dot_dimension_numbers<[1], [0], [0], [1], [0, 0, 1, 1], [], []>} : vector<16x128xbf16>, vector<128x384xbf16>, vector<16x384xf32> -> vector<16x384xf32>
    %34 = vector.extract_strided_slice %33 {offsets = [0, 0], sizes = [16, 128], strides = [1, 1]} : vector<16x384xf32> to vector<16x128xf32>
    %35 = vector.extract_strided_slice %33 {offsets = [0, 128], sizes = [16, 128], strides = [1, 1]} : vector<16x384xf32> to vector<16x128xf32>
    %36 = vector.extract_strided_slice %33 {offsets = [0, 256], sizes = [16, 128], strides = [1, 1]} : vector<16x384xf32> to vector<16x128xf32>
    %c1_i32_14 = arith.constant 1 : i32
    %37 = tpu.dynamic_rotate %34 by %c1_i32_14 dim 0 : vector<16x128xf32>, i32 -> vector<16x128xf32>
    %c15_i32_15 = arith.constant 15 : i32
    %38 = tpu.dynamic_rotate %36 by %c15_i32_15 dim 0 : vector<16x128xf32>, i32 -> vector<16x128xf32>
    %cst_16 = arith.constant 0.000000e+00 : f32
    %39 = vector.shape_cast %6 : vector<16x1xi1> to vector<16x1xi1>
    %40 = vector.broadcast %39 : vector<16x1xi1> to vector<16x128xi1>
    %41 = vector.broadcast %cst_16 : f32 to vector<16x128xf32>
    %42 = arith.select %40, %37, %41 : vector<16x128xi1>, vector<16x128xf32>
    %43 = arith.addf %35, %42 : vector<16x128xf32>
    %cst_17 = arith.constant 0.000000e+00 : f32
    %44 = vector.shape_cast %7 : vector<16x1xi1> to vector<16x1xi1>
    %45 = vector.broadcast %44 : vector<16x1xi1> to vector<16x128xi1>
    %46 = vector.broadcast %cst_17 : f32 to vector<16x128xf32>
    %47 = arith.select %45, %38, %46 : vector<16x128xi1>, vector<16x128xf32>
    %48 = arith.addf %43, %47 : vector<16x128xf32>
    %c0_18 = arith.constant 0 : index
    %c0_19 = arith.constant 0 : index
    %49 = vector.load %arg5[%c0_18, %c0_19] : memref<1x128xf32, #tpu.memory_space<vmem>>, vector<1x128xf32>
    %50 = vector.broadcast %49 : vector<1x128xf32> to vector<16x128xf32>
    %51 = arith.addf %48, %50 : vector<16x128xf32>
    %52 = vector.extract_strided_slice %9 {offsets = [0, 384], sizes = [16, 128], strides = [1, 1]} : vector<16x512xf32> to vector<16x128xf32>
    %53 = arith.addf %51, %52 : vector<16x128xf32>
    %cst_20 = arith.constant 0.000000e+00 : f32
    %54 = vector.broadcast %cst_20 : f32 to vector<16x128xf32>
    %55 = arith.maximumf %53, %54 : vector<16x128xf32>
    %56 = arith.truncf %55 : vector<16x128xf32> to vector<16x128xbf16>
    %c0_21 = arith.constant 0 : index
    %c0_22 = arith.constant 0 : index
    %57 = vector.load %arg6[%c0_21, %c0_22] : memref<16x128xbf16, #tpu.memory_space<vmem>>, vector<16x128xbf16>
    tpu.vector_store %arg6[%c0_21, %c0_22], %56 {strides = array<i32>} : memref<16x128xbf16, #tpu.memory_space<vmem>>, vector<16x128xbf16>,
    return
  }
  func.func @transform_0(%arg0: i32) -> (i32, i32) {
    %c0_i32 = arith.constant 0 : i32
    %c0_i32_0 = arith.constant 0 : i32
    return %arg0, %c0_i32 : i32, i32
  }
  func.func @transform_1(%arg0: i32) -> (i32, i32) {
    %c0_i32 = arith.constant 0 : i32
    %c0_i32_0 = arith.constant 0 : i32
    %c0_i32_1 = arith.constant 0 : i32
    return %c0_i32, %c0_i32_0 : i32, i32
  }
  func.func @transform_2(%arg0: i32) -> (i32, i32) {
    %c0_i32 = arith.constant 0 : i32
    %c0_i32_0 = arith.constant 0 : i32
    %c0_i32_1 = arith.constant 0 : i32
    return %c0_i32, %c0_i32_0 : i32, i32
  }
  func.func @transform_3(%arg0: i32) -> (i32, i32) {
    %c0_i32 = arith.constant 0 : i32
    %c0_i32_0 = arith.constant 0 : i32
    %c0_i32_1 = arith.constant 0 : i32
    return %c0_i32, %c0_i32_0 : i32, i32
  }
  func.func @transform_4(%arg0: i32) -> (i32, i32) {
    %c0_i32 = arith.constant 0 : i32
    %c0_i32_0 = arith.constant 0 : i32
    %c0_i32_1 = arith.constant 0 : i32
    return %c0_i32, %c0_i32_0 : i32, i32
  }
  func.func @transform_5(%arg0: i32) -> (i32, i32) {
    %c0_i32 = arith.constant 0 : i32
    %c0_i32_0 = arith.constant 0 : i32
    return %arg0, %c0_i32 : i32, i32
  }
}

</mosaic_0001>

<bundles_post_ra>
// kernel: tile.18
= control target key start
LH: loop header
LB: loop body
LE: loop exit
PB: predicated region body
PF: predicated region fallthrough
CT: control target
= control target key end

     0   :  { %s28_s0 = inlined_call_operand.vmem [shape: f32[8], index: 0, kind: input, shape index: {}]   ;;  %s29_s1 = inlined_call_operand.vmem [shape: f32[16,8], index: 1, kind: output, shape index: {}]  }
   0x1   :  { %v4_v0 = vld [vmem:[%s28_s0] ss:$0 sm:$0xff] }
   0x2   :  { %5 = vst [vmem:[%s29_s1] sm:$0xff] %v4_v0  ;;  %8 = vst [vmem:[%s29_s1 + $0x8] sm:$0xff] %v4_v0 }

// kernel: tile.19
= control target key start
LH: loop header
LB: loop body
LE: loop exit
PB: predicated region body
PF: predicated region fallthrough
CT: control target
= control target key end

     0   :  { %s133_s10 = smov 120   ;;  %s134_s11 = smov 104   ;;  %vm3_vm0 = vcmask 64512   ;;  %vm9_vm1 = vcmask 1048512   ;;  %vm15_vm2 = vcmask 982912   ;;  %vm21_vm3 = vcmask 917312   ;;  %s209_s0 = inlined_call_operand.vmem [shape: f32[16,8], index: 0, kind: input, shape index: {}]   ;;  %s210_s1 = inlined_call_operand.vmem [shape: f32[1,128], index: 1, kind: output, shape index: {}]  }
   0x1   :  { %v103_v0 = vld [vmem:[%s209_s0 + $0xf] sm:$0x1]   ;;  %v105_v1 = vld [vmem:[%s209_s0 + $0xd] sm:$0x1]   ;;  %v104_v2 = vld [vmem:[%s209_s0 + $0xe] sm:$0x1]  }
   0x2   :  { %7 = vrot.lane.b32.xlu0 %v103_v0, %s133_s10  ;;  %19 = vrot.lane.b32.xlu1 %v105_v1, %s134_s11  ;;  %v106_v3 = vld [vmem:[%s209_s0 + $0xc] sm:$0x1]   ;;  %s135_s16 = smov 112   ;;  %s136_s17 = smov 96   ;;  %v107_v4 = vld [vmem:[%s209_s0 + $0xb] sm:$0x1]  }
   0x3   :  { %v108_v5 = vld [vmem:[%s209_s0 + $0xa] sm:$0x1]   ;;  %v2_v6 = vld [vmem:[%s209_s0] sm:$0x1]   ;;  %s137_s24 = smov 88   ;;  %s138_s25 = smov 80  }
   0x4   :  { %4 = vst.msk [vmem:[#allocation0] sm:$0x1] %vm3_vm0, %v2_v6   ;;  %v109_v7 = vld [vmem:[%s209_s0 + $0x9] sm:$0x1]   ;;  %v110_v8 = vld [vmem:[%s209_s0 + $0x8] sm:$0x1]  }
   0x5   :  { %s139_s30 = smov 72   ;;  %s140_s2 = smov 64   ;;  %v111_v9 = vld [vmem:[%s209_s0 + $0x7] sm:$0x1]   ;;  %v112_v10 = vld [vmem:[%s209_s0 + $0x6] sm:$0x1]  }
   0x6   :  { %13 = vrot.lane.b32.xlu0 %v104_v2, %s135_s16  ;;  %25 = vrot.lane.b32.xlu1 %v106_v3, %s136_s17  ;;  %s141_s7 = smov 56   ;;  %s142_s8 = smov 48   ;;  %v113_v11 = vld [vmem:[%s209_s0 + $0x5] sm:$0x1]   ;;  %v114_v12 = vld [vmem:[%s209_s0 + $0x4] sm:$0x1]  }
   0x7   :  { %s143_s13 = smov 40   ;;  %s144_s14 = smov 32   ;;  %v115_v13 = vld [vmem:[%s209_s0 + $0x3] sm:$0x1]   ;;  %v116_v14 = vld [vmem:[%s209_s0 + $0x2] sm:$0x1]  }
   0x8   :  { %s145_s19 = smov 24   ;;  %s146_s20 = smov 16   ;;  %v117_v15 = vld [vmem:[%s209_s0 + $0x1] sm:$0x1]   ;;  %vm27_vm4 = vcmask 851712   ;;  %vm33_vm5 = vcmask 786112  }
   0x9   :  { %s147_s0 = smov 8   ;;  %vm39_vm6 = vcmask 720512   ;;  %vm45_vm7 = vcmask 654912   ;;  %vm51_vm8 = vcmask 589312   ;;  %vm57_vm9 = vcmask 523712  }
   0xa   :  { %31 = vrot.lane.b32.xlu0 %v107_v4, %s137_s24  ;;  %37 = vrot.lane.b32.xlu1 %v108_v5, %s138_s25  ;;  %vm63_vm10 = vcmask 458112   ;;  %vm69_vm11 = vcmask 392512   ;;  %vm75_vm12 = vcmask 326912   ;;  %vm81_vm13 = vcmask 261312  }
   0xb   :  { %vm87_vm14 = vcmask 195712   ;;  %vm93_vm15 = vcmask 130112  }
   0xe   :  { %43 = vrot.lane.b32.xlu0 %v109_v7, %s139_s30  ;;  %49 = vrot.lane.b32.xlu1 %v110_v8, %s140_s2 }
  0x12   :  { %55 = vrot.lane.b32.xlu0 %v111_v9, %s141_s7  ;;  %61 = vrot.lane.b32.xlu1 %v112_v10, %s142_s8 }
  0x16   :  { %67 = vrot.lane.b32.xlu0 %v113_v11, %s143_s13  ;;  %73 = vrot.lane.b32.xlu1 %v114_v12, %s144_s14 }
  0x1a   :  { %79 = vrot.lane.b32.xlu0 %v115_v13, %s145_s19  ;;  %85 = vrot.lane.b32.xlu1 %v116_v14, %s146_s20 }
  0x1e   :  { %91 = vrot.lane.b32.xlu0 %v117_v15, %s147_s0 }
  0x74   :  { %v8_v16 = vpop.permute.xlu0 %7   ;;  %v20_v17 = vpop.permute.xlu1 %19  }
  0x75   :  { %10 = vst.msk [vmem:[#allocation0] sm:$0x1] %vm9_vm1, %v8_v16  }
  0x78   :  { %v14_v18 = vpop.permute.xlu0 %13   ;;  %v26_v19 = vpop.permute.xlu1 %25  }
  0x79   :  { %16 = vst.msk [vmem:[#allocation0] sm:$0x1] %vm15_vm2, %v14_v18  }
  0x7a   :  { %22 = vst.msk [vmem:[#allocation0] sm:$0x1] %vm21_vm3, %v20_v17  }
  0x7b   :  { %28 = vst.msk [vmem:[#allocation0] sm:$0x1] %vm27_vm4, %v26_v19  }
  0x7c   :  { %v32_v20 = vpop.permute.xlu0 %31   ;;  %v38_v21 = vpop.permute.xlu1 %37  }
  0x7d   :  { %34 = vst.msk [vmem:[#allocation0] sm:$0x1] %vm33_vm5, %v32_v20  }
  0x7e   :  { %40 = vst.msk [vmem:[#allocation0] sm:$0x1] %vm39_vm6, %v38_v21  }
  0x80   :  { %v44_v22 = vpop.permute.xlu0 %43   ;;  %v50_v23 = vpop.permute.xlu1 %49  }
  0x81   :  { %46 = vst.msk [vmem:[#allocation0] sm:$0x1] %vm45_vm7, %v44_v22  }
  0x82   :  { %52 = vst.msk [vmem:[#allocation0] sm:$0x1] %vm51_vm8, %v50_v23  }
  0x84   :  { %v56_v24 = vpop.permute.xlu0 %55   ;;  %v62_v25 = vpop.permute.xlu1 %61  }
  0x85   :  { %58 = vst.msk [vmem:[#allocation0] sm:$0x1] %vm57_vm9, %v56_v24  }
  0x86   :  { %64 = vst.msk [vmem:[#allocation0] sm:$0x1] %vm63_vm10, %v62_v25  }
  0x88   :  { %v68_v26 = vpop.permute.xlu0 %67   ;;  %v74_v27 = vpop.permute.xlu1 %73  }
  0x89   :  { %70 = vst.msk [vmem:[#allocation0] sm:$0x1] %vm69_vm11, %v68_v26  }
  0x8a   :  { %76 = vst.msk [vmem:[#allocation0] sm:$0x1] %vm75_vm12, %v74_v27  }
  0x8c   :  { %v80_v28 = vpop.permute.xlu0 %79   ;;  %v86_v29 = vpop.permute.xlu1 %85  }
  0x8d   :  { %82 = vst.msk [vmem:[#allocation0] sm:$0x1] %vm81_vm13, %v80_v28  }
  0x8e   :  { %88 = vst.msk [vmem:[#allocation0] sm:$0x1] %vm87_vm14, %v86_v29  }
  0x90   :  { %v92_v30 = vpop.permute.xlu0 %91  }
  0x91   :  { %94 = vst.msk [vmem:[#allocation0] sm:$0x1] %vm93_vm15, %v92_v30  }
  0x98   :  { %v99_v31 = vld [vmem:[#allocation0] sm:$0x1] }
  0x99   :  { %102 = vst [vmem:[%s210_s1] sm:$0x1] %v99_v31 }

// kernel: basic_block_forward.1
= control target key start
LH: loop header
LB: loop body
LE: loop exit
PB: predicated region body
PF: predicated region fallthrough
CT: control target
= control target key end

     0   :  { %s1015_s18 = smov 0   ;;  %s1189_s0 = inlined_call_operand.vmem [shape: bf16[32,64], index: 0, kind: input, shape index: {}]   ;;  %s1190_s1 = inlined_call_operand.vmem [shape: bf16[64,512], index: 1, kind: input, shape index: {}]   ;;  %s1191_s2 = inlined_call_operand.vmem [shape: bf16[128,384], index: 2, kind: input, shape index: {}]   ;;  %s1192_s3 = inlined_call_operand.vmem [shape: f32[1,128], index: 3, kind: input, shape index: {}]   ;;  %s1193_s4 = inlined_call_operand.vmem [shape: f32[1,128], index: 4, kind: input, shape index: {}]   ;;  %s1194_s5 = inlined_call_operand.vmem [shape: bf16[32,128], index: 5, kind: output, shape index: {}]  }
   0x1 LB: > { %s810_s19 = sadd.s32 4294967295, %s979_s18   ;;  %p814_p0 = scmp.ge.s32.totalorder %s979_s18, 1  ;;  %s979_s18 = sphi %s1015_s18, %s15_s18  }
   0x2   : > { %p188_p1 = scmp.lt.s32.totalorder %s979_s18, 3 }
   0x4   : > { %p189_p2 = pnand %p814_p0, %p188_p1 }
   0x5   : > { %s815_s22 = sshll.u32 (!%p189_p2), %s810_s19, 1 }
   0x6   : > { %192 = sbr.rel (%p189_p2) target bundleno = 454 (0x1c6), region = 40  ;;  %p217_p3 = scmp.lt.s32.totalorder (!%p189_p2), %s815_s22, 3 }
   0xb   : > { %v916_v0 = vld [vmem:[%s1190_s1 + $0x64] ss:$16 sps:$4 sm:$0xff]   ;;  %v918_v1 = vld [vmem:[%s1190_s1 + $0x6c] ss:$16 sps:$4 sm:$0xff]   ;;  %v981_v2 = vmov 0   ;;  %s1200_s22 = smov (!%p217_p3, %s815_s22), 3  ;;  %v231_v43 = vlaneseq }
   0xc   : > { %379 = vmatprep.mubr.bf16.mxu0 %v981_v2  ;;  %422 = vmatprep.mubr.bf16.mxu1 %v981_v2  ;;  %v920_v3 = vld [vmem:[%s1190_s1 + $0x60] ss:$16 sps:$4 sm:$0xff]   ;;  %v921_v4 = vld [vmem:[%s1190_s1 + $0x68] ss:$16 sps:$4 sm:$0xff]   ;;  %v922_v5 = vld [vmem:[%s1190_s1 + $0x44] ss:$16 sps:$4 sm:$0xff]  }
   0xd   : > { %355 = vmatprep.subr.bf16.mxu0 %v916_v0  ;;  %398 = vmatprep.subr.bf16.mxu1 %v918_v1  ;;  %v924_v6 = vld [vmem:[%s1190_s1 + $0x4c] ss:$16 sps:$4 sm:$0xff]   ;;  %v926_v7 = vld [vmem:[%s1190_s1 + $0x40] ss:$16 sps:$4 sm:$0xff]   ;;  %v927_v8 = vld [vmem:[%s1190_s1 + $0x48] ss:$16 sps:$4 sm:$0xff]  }
   0xe   : > { %356 = vmatpush1.bf16.msra.mxu0 %v920_v3  ;;  %399 = vmatpush1.bf16.msra.mxu1 %v921_v4  ;;  %v928_v9 = vld [vmem:[%s1190_s1 + $0x24] ss:$16 sps:$4 sm:$0xff]   ;;  %s816_s14 = sshll.u32 %s1200_s22, 2  ;;  %v930_v10 = vld [vmem:[%s1190_s1 + $0x2c] ss:$16 sps:$4 sm:$0xff]   ;;  %vm343_vm0 = vcmask 523264  }
   0xf   : > { %357 = vmatprep.subr.bf16.mxu0 %v922_v5  ;;  %400 = vmatprep.subr.bf16.mxu1 %v924_v6  ;;  %v932_v11 = vld [vmem:[%s1190_s1 + $0x20] ss:$16 sps:$4 sm:$0xff]   ;;  %v933_v12 = vld [vmem:[%s1190_s1 + $0x28] ss:$16 sps:$4 sm:$0xff]   ;;  %v934_v13 = vld [vmem:[%s1190_s1 + $0x4] ss:$16 sps:$4 sm:$0xff]   ;;  %s220_s29 = scalar_lea.vmem %s1189_s0, %s816_s14  ;;  %s226_s21 = scalar_lea.vmem %s1194_s5, %s816_s14 }
  0x10   : > { %v936_v14 = vld [vmem:[%s1190_s1 + $0xc] ss:$16 sps:$4 sm:$0xff]   ;;  %v938_v15 = vld [vmem:[%s1190_s1] ss:$16 sps:$4 sm:$0xff]   ;;  %v939_v16 = vld [vmem:[%s1190_s1 + $0x8] ss:$16 sps:$4 sm:$0xff]  }
  0x11   : > { %v943_v17 = vld [vmem:[%s1191_s2 + $0xac] ss:$12 sps:$4 sm:$0xff]   ;;  %v940_v18 = vld [vmem:[%s220_s29] sm:$0xff]   ;;  %v941_v19 = vld [vmem:[%s1191_s2 + $0xa8] ss:$12 sps:$4 sm:$0xff]   ;;  %v982_v21 = vmov 0.0  }
  0x12   : > { %358 = vmatpush1.bf16.msra.mxu0 %v926_v7  ;;  %401 = vmatpush1.bf16.msra.mxu1 %v927_v8  ;;  %v944_v20 = vld [vmem:[%s1191_s2 + $0xb0] ss:$12 sps:$4 sm:$0xff]   ;;  %v947_v22 = vld [vmem:[%s1191_s2 + $0x94] ss:$12 sps:$4 sm:$0xff]   ;;  %v948_v24 = vld [vmem:[%s1191_s2 + $0x98] ss:$12 sps:$4 sm:$0xff]  }
  0x13   : > { %359 = vmatprep.subr.bf16.mxu0 %v928_v9  ;;  %402 = vmatprep.subr.bf16.mxu1 %v930_v10  ;;  %v945_v23 = vld [vmem:[%s1191_s2 + $0x90] ss:$12 sps:$4 sm:$0xff]   ;;  %v949_v26 = vld [vmem:[%s1191_s2 + $0x78] ss:$12 sps:$4 sm:$0xff]   ;;  %v952_v27 = vld [vmem:[%s1191_s2 + $0x80] ss:$12 sps:$4 sm:$0xff]  }
  0x14   : > { %v951_v25 = vld [vmem:[%s1191_s2 + $0x7c] ss:$12 sps:$4 sm:$0xff]   ;;  %v955_v28 = vld [vmem:[%s1191_s2 + $0x64] ss:$12 sps:$4 sm:$0xff]   ;;  %v953_v29 = vld [vmem:[%s1191_s2 + $0x60] ss:$12 sps:$4 sm:$0xff]  }
  0x15   : > { %v956_v30 = vld [vmem:[%s1191_s2 + $0x68] ss:$12 sps:$4 sm:$0xff]   ;;  %v959_v31 = vld [vmem:[%s1191_s2 + $0x4c] ss:$12 sps:$4 sm:$0xff]   ;;  %v960_v33 = vld [vmem:[%s1191_s2 + $0x50] ss:$12 sps:$4 sm:$0xff]  }
  0x16   : > { %360 = vmatpush1.bf16.msra.mxu0 %v932_v11  ;;  %403 = vmatpush1.bf16.msra.mxu1 %v933_v12  ;;  %v957_v32 = vld [vmem:[%s1191_s2 + $0x48] ss:$12 sps:$4 sm:$0xff]   ;;  %v961_v35 = vld [vmem:[%s1191_s2 + $0x30] ss:$12 sps:$4 sm:$0xff]   ;;  %v964_v36 = vld [vmem:[%s1191_s2 + $0x38] ss:$12 sps:$4 sm:$0xff]  }
  0x17   : > { %361 = vmatprep.subr.bf16.mxu0 %v934_v13  ;;  %404 = vmatprep.subr.bf16.mxu1 %v936_v14  ;;  %v963_v34 = vld [vmem:[%s1191_s2 + $0x34] ss:$12 sps:$4 sm:$0xff]   ;;  %v967_v37 = vld [vmem:[%s1191_s2 + $0x1c] ss:$12 sps:$4 sm:$0xff]   ;;  %v965_v38 = vld [vmem:[%s1191_s2 + $0x18] ss:$12 sps:$4 sm:$0xff]  }
  0x18   : > { %v968_v39 = vld [vmem:[%s1191_s2 + $0x20] ss:$12 sps:$4 sm:$0xff]   ;;  %v971_v40 = vld [vmem:[%s1191_s2 + $0x4] ss:$12 sps:$4 sm:$0xff]   ;;  %v972_v42 = vld [vmem:[%s1191_s2 + $0x8] ss:$12 sps:$4 sm:$0xff]  }
  0x19   : > { %v969_v41 = vld [vmem:[%s1191_s2] ss:$12 sps:$4 sm:$0xff]   ;;  %vm983_vm1 = vmmov 0   ;;  %v232_v44 = vshrl.u32 %v231_v43, 7  ;;  %vm984_vm6 = vmmov 1  }
  0x1a   : > { %362 = vmatpush1.bf16.msra.mxu0 %v938_v15  ;;  %405 = vmatpush1.bf16.msra.mxu1 %v939_v16 }
  0x1b   : > { %631 = vmatprep.subr.bf16.mxu0 %v943_v17  ;;  %884 = vmatprep.subr.bf16.mxu1 %v982_v21  ;;  %v233_v45 = vadd.s32 8, %v232_v44  ;;  %vm234_vm2 = vcmp.eq.s32.totalorder %v232_v44, 0  ;;  %vm435_vm4 = vcmp.lt.s32.totalorder %v232_v44, 1  ;;  %vm440_vm5 = vcmp.lt.s32.totalorder %v232_v44, 7 }
  0x1c   : > { %vm1151_vm7 = vmxor %vm234_vm2, %vm984_vm6 }
  0x1d   : > { %836 = vmatmul.mubr.msk.bf16.vlgmr.msra.gmra.mxu0 %vm343_vm0, %v940_v18  ;;  %837 = vmatmul.mubr.msk.bf16.vlgmr.msra.gmra.mxu1 %vm343_vm0, %v940_v18  ;;  %vm237_vm3 = vcmp.eq.s32.totalorder %v233_v45, 15 }
  0x1e   : > { %632 = vmatpush1.bf16.msra.mxu0 %v941_v19  ;;  %885 = vmatpush3.bf16.msra.mxu1 %v944_v20  ;;  %vm1155_vm8 = vmxor %vm237_vm3, %vm984_vm6 }
  0x1f   : > { %633 = vmatprep.subr.bf16.mxu0 %v947_v22  ;;  %886 = vmatprep.subr.bf16.mxu1 %v982_v21 }
  0x20   : > { %663 = vmatprep.mubr.bf16.mxu0 %v981_v2  ;;  %900 = vmatprep.mubr.msk.bf16.mxu1 %vm983_vm1, %v982_v21  ;;  %v838_v2 = vld [vmem:[%s1192_s3] ss:$0 sm:$0xff] }
  0x22   : > { %634 = vmatpush1.bf16.msra.mxu0 %v945_v23  ;;  %887 = vmatpush3.bf16.msra.mxu1 %v948_v24 }
  0x23   : > { %635 = vmatprep.subr.bf16.mxu0 %v951_v25  ;;  %888 = vmatprep.subr.bf16.mxu1 %v982_v21 }
  0x26   : > { %636 = vmatpush1.bf16.msra.mxu0 %v949_v26  ;;  %889 = vmatpush3.bf16.msra.mxu1 %v952_v27 }
  0x27   : > { %637 = vmatprep.subr.bf16.mxu0 %v955_v28  ;;  %890 = vmatprep.subr.bf16.mxu1 %v982_v21 }
  0x2a   : > { %638 = vmatpush1.bf16.msra.mxu0 %v953_v29  ;;  %891 = vmatpush3.bf16.msra.mxu1 %v956_v30 }
  0x2b   : > { %892 = vmatprep.subr.bf16.mxu1 %v982_v21  ;;  %639 = vmatprep.subr.bf16.mxu0 %v959_v31  ;;  %v863_v31 = vld [vmem:[%s1193_s4] ss:$0 sm:$0xff] }
  0x2e   : > { %640 = vmatpush1.bf16.msra.mxu0 %v957_v32  ;;  %893 = vmatpush3.bf16.msra.mxu1 %v960_v33 }
  0x2f   : > { %894 = vmatprep.subr.bf16.mxu1 %v982_v21  ;;  %641 = vmatprep.subr.bf16.mxu0 %v963_v34 }
  0x32   : > { %642 = vmatpush1.bf16.msra.mxu0 %v961_v35  ;;  %895 = vmatpush3.bf16.msra.mxu1 %v964_v36 }
  0x33   : > { %896 = vmatprep.subr.bf16.mxu1 %v982_v21  ;;  %643 = vmatprep.subr.bf16.mxu0 %v967_v37 }
  0x36   : > { %644 = vmatpush1.bf16.msra.mxu0 %v965_v38  ;;  %897 = vmatpush3.bf16.msra.mxu1 %v968_v39 }
  0x37   : > { %898 = vmatprep.subr.bf16.mxu1 %v982_v21  ;;  %645 = vmatprep.subr.bf16.mxu0 %v971_v40 }
  0x3a   : > { %646 = vmatpush1.bf16.msra.mxu0 %v969_v41  ;;  %899 = vmatpush3.bf16.msra.mxu1 %v972_v42 }
  0xdd   : > { %v381_v46 = vpop.f32.mrf.mxu0  ;;  %v424_v47 = vpop.f32.mrf.mxu1 }
  0xde   : > { %v433_v53 = vrot.slane %v381_v46, 7  ;;  %v438_v54 = vrot.slane %v424_v47, 1 }
  0xdf   : > { %v383_v48 = vpop.f32.mrf.mxu0  ;;  %v426_v49 = vpop.f32.mrf.mxu1 }
  0xe1   : > { %v385_v50 = vpop.f32.mrf.mxu0  ;;  %v428_v51 = vpop.f32.mrf.mxu1 }
  0xe2   : > { %v434_v55 = vrot.slane %v385_v50, 7  ;;  %v439_v56 = vrot.slane %v428_v51, 1 }
  0xe3   : > { %v387_v58 = vpop.f32.mrf.mxu0  ;;  %v430_v11 = vpop.f32.mrf.mxu1 }
  0xe4   : > { %v437_v59 = vsel %vm435_vm4, %v434_v55, %v433_v53  ;;  %v436_v60 = vsel %vm435_vm4, %v433_v53, %v434_v55  ;;  %v442_v61 = vsel %vm440_vm5, %v439_v56, %v438_v54  ;;  %v441_v3 = vsel %vm440_vm5, %v438_v54, %v439_v56 }
  0xe5   : > { %v447_v62 = vsel %vm1151_vm7, %v437_v59, 0.0  ;;  %v450_v63 = vadd.f32 %v436_v60, %v387_v58  ;;  %v456_v0 = vsel %vm1155_vm8, %v442_v61, 0.0 }
  0xe6   : > { %v449_v1 = vadd.f32 %v447_v62, %v383_v48 }
  0xe7   : > { %v458_v4 = vadd.f32 %v456_v0, %v450_v63 }
  0xe8   : > { %v457_v5 = vadd.f32 %v449_v1, %v441_v3 }
  0xe9   : > { %v467_v6 = vadd.f32 %v838_v2, %v458_v4 }
  0xea   : > { %v466_v7 = vadd.f32 %v838_v2, %v457_v5 }
  0xeb   : > { %v469_v8 = vmax.f32 %v467_v6, 0.0 }
  0xec   : > { %v468_v9 = vmax.f32 %v466_v7, 0.0 }
  0xee   : > { %v470_v10 = vpack.c.bf16 %v469_v8, %v468_v9 }
  0xf0   : > { %664 = vmatmul.mubr.bf16.vlgmr.msra.gmra.mxu0 %v470_v10  ;;  %901 = vmatmul.mubr.bf16.vlgmr.msra.gmra.mxu1 %v470_v10 }
 0x1b0   : > { %v665_v12 = vpop.f32.mrf.mxu0  ;;  %v708_v13 = vpop.f32.mrf.mxu1 }
 0x1b1   : > { %v715_v18 = vrot.slane %v665_v12, 7  ;;  %v719_v19 = vrot.slane %v708_v13, 1 }
 0x1b2   : > { %v667_v14 = vpop.f32.mrf.mxu0  ;;  %v902_v15 = vpop.f32.mrf.mxu1 }
 0x1b4   : > { %v669_v16 = vpop.f32.mrf.mxu0  ;;  %v711_v17 = vpop.f32.mrf.mxu1 }
 0x1b5   : > { %v716_v20 = vrot.slane %v669_v16, 7  ;;  %v720_v21 = vrot.slane %v711_v17, 1 }
 0x1b6   : > { %v671_v22 = vpop.f32.mrf.mxu0  ;;  %v903_v23 = vpop.f32.mrf.mxu1 }
 0x1b7   : > { %v718_v24 = vsel %vm435_vm4, %v716_v20, %v715_v18  ;;  %v717_v25 = vsel %vm435_vm4, %v715_v18, %v716_v20  ;;  %v722_v26 = vsel %vm440_vm5, %v720_v21, %v719_v19  ;;  %v721_v32 = vsel %vm440_vm5, %v719_v19, %v720_v21 }
 0x1b8   : > { %v723_v27 = vsel %vm1151_vm7, %v718_v24, 0.0  ;;  %v726_v28 = vadd.f32 %v717_v25, %v671_v22  ;;  %v728_v29 = vsel %vm1155_vm8, %v722_v26, 0.0 }
 0x1b9   : > { %v725_v30 = vadd.f32 %v723_v27, %v667_v14 }
 0x1ba   : > { %v730_v33 = vadd.f32 %v728_v29, %v726_v28 }
 0x1bb   : > { %v729_v34 = vadd.f32 %v725_v30, %v721_v32 }
 0x1bc   : > { %v739_v35 = vadd.f32 %v863_v31, %v730_v33 }
 0x1bd   : > { %v738_v36 = vadd.f32 %v863_v31, %v729_v34 }
 0x1be   : > { %v741_v37 = vadd.f32 %v739_v35, %v430_v11 }
 0x1bf   : > { %v740_v38 = vadd.f32 %v738_v36, %v426_v49 }
 0x1c0   : > { %v743_v39 = vmax.f32 %v741_v37, 0.0 }
 0x1c1   : > { %v742_v40 = vmax.f32 %v740_v38, 0.0 }
 0x1c3   : > { %v873_v41 = vpack.c.bf16 %v743_v39, %v742_v40 }
 0x1c5   : > { %874 = vst [vmem:[%s226_s21] sm:$0xff] %v873_v41  }
 0x1c6 PF: > { %s15_s18 = sadd.s32 1, %s979_s18  }
 0x1c7   : > { %p12_p4 = scmp.ge.s32.totalorder %s15_s18, 4  }
 0x1c9   :  { %14 = sbr.rel (!%p12_p4) target bundleno = 1 (0x1), region = 70 }

</bundles_post_ra>
